<compile_context>
chip_gen: v5e
topology: v5e:2x2
jax: 0.10.0
libtpu: 0.0.40
codegen_flags: <defaults>
</compile_context>

<pallas_src>
import functools

import numpy as np

import jax
import jax.numpy as jnp
from jax import lax
from jax.experimental import pallas as pl
from jax.experimental.pallas import tpu as pltpu

NEG_SLOPE = 0.05  # RFDN lrelu negative slope


def _round_up(x, m):
    return (x + m - 1) // m * m


# ----------------------------------------------------------------------------
# In-kernel helpers (activations are (C, H*W): channels on sublanes, pixel
# index on the 128-wide lane axis).
# ----------------------------------------------------------------------------
def _act(y, act):
    if act == "lrelu":
        return jnp.where(y >= 0, y, NEG_SLOPE * y)
    if act == "relu":
        return jnp.maximum(y, 0.0)
    if act == "sigmoid":
        # exp (EUP) + approximate reciprocal (EUP) -> no VALU divide.
        return pl.reciprocal(1.0 + jnp.exp(-y), approx=True)
    return y


def _tap_shifts(H, W, roll_like_jnp):
    """Lane-roll amounts for the 9 taps of a 3x3 / pad=1 conv on a (C, H*W)
    activation (tap order matches the host-side weight packing)."""
    P = H * W
    shifts = []
    for di in (-1, 0, 1):
        for dj in (-1, 0, 1):
            s = di * W + dj                     # want out[:, m] = x[:, m + s]
            shifts.append(((-s) % P) if roll_like_jnp else (s % P))
    return shifts


# ----------------------------------------------------------------------------
# The single fused kernel: head conv -> 4 FDCB blocks (+ ESA) -> tail.
# ----------------------------------------------------------------------------
def _fdcn_kernel(H, W, layout, x_ref, m_ref, w_ref, b_ref, o_ref):
    P = H * W
    dc = layout["dc"]
    shifts = _tap_shifts(H, W, layout["roll_like_jnp"])

    masks = m_ref[...]                            # (10, P) bf16, loaded once
    tap_m = [masks[i:i + 1, :] for i in range(9)]
    pool_m = masks[9:10, :] > 0                   # ESA max-pool footprint

    def layer(entry, taps, act=None):
        """(cout, k) bf16 slab slice @ (k, P) bf16 taps -> f32 + bias + act."""
        off, cout, k = entry
        y = jnp.dot(w_ref[off:off + cout, 0:k], taps,
                    preferred_element_type=jnp.float32)
        return _act(y + b_ref[off:off + cout, :], act)

    def im2col(x_f32):
        """(C, P) f32 -> (9C, P) bf16 tap matrix via XLU rolls (no HBM im2col,
        no slice+concat lane shuffles); wrapped lanes are boundary-masked."""
        xb = x_f32.astype(jnp.bfloat16)
        cols = [xb if s == 0 else pltpu.roll(xb, s, axis=1) * m
                for s, m in zip(shifts, tap_m)]
        return jnp.concatenate(cols, axis=0)

    bf16 = lambda v: v.astype(jnp.bfloat16)

    def fdcb(x, e):
        """One FDCB block: distillation backbone (no residual adds along the
        r-path, per the FDCN spec) + ESA attention, all in vregs.  Sibling
        convs cX_d (1x1) + cX_r (3x3) share their input and are fused into one
        matmul (the 1x1 occupies the centre-tap rows of the packed weight)."""
        y = layer(e["cr1"], im2col(x), act="lrelu")
        d1, r1 = y[:dc], y[dc:]
        y = layer(e["cr2"], im2col(r1), act="lrelu")
        d2, r2 = y[:dc], y[dc:]
        y = layer(e["cr3"], im2col(r2), act="lrelu")
        d3, r3 = y[:dc], y[dc:]
        r4 = layer(e["c4"], im2col(r3), act="lrelu")
        feat = layer(e["c5"], bf16(jnp.concatenate([d1, d2, d3, r4], axis=0)))

        # ESA: the pooled attention map is 1x1 at these spatial sizes, so the
        # stride-2 conv2 is read off the same pad-1 tap matrix, max_pool(7,3)
        # becomes a masked lane-max, conv_max/conv3/conv3_ act on a uniform
        # map (centre taps; kept at full lane width for robust lowering) and
        # the bilinear upsample of the 1x1 map is a broadcast.
        c1_ = layer(e["e1"], bf16(feat))
        g = layer(e["e2"], im2col(c1_))
        v = jnp.max(jnp.where(pool_m, g, -jnp.inf), axis=1, keepdims=True)
        v = jnp.broadcast_to(v, (v.shape[0], P))
        vr = layer(e["emax"], bf16(v), act="relu")
        c3 = layer(e["e3"], bf16(vr), act="relu")
        c3 = layer(e["e3b"], bf16(c3))
        cf = layer(e["ef"], bf16(c1_))
        att = layer(e["e4"], bf16(cf + c3), act="sigmoid")
        return feat * att

    fea = layer(layout["head"], im2col(x_ref[0]))
    b1 = fdcb(fea, layout["B1"])
    b2 = fdcb(b1, layout["B2"])
    b3 = fdcb(b2, layout["B3"])
    b4 = fdcb(b3, layout["B4"])
    cat = bf16(jnp.concatenate([b1, b2, b3, b4], axis=0))
    out_b = layer(layout["c"], cat, act="lrelu")
    out_lr = layer(layout["lr"], im2col(out_b)) + fea
    o_ref[0] = layer(layout["up"], im2col(out_lr))


# ----------------------------------------------------------------------------
# Host-side weight packing (done ONCE, outside the jitted forward)
# ----------------------------------------------------------------------------
class _SlabPacker:
    """Packs every conv into one bf16 (rows, k_max) weight slab and one f32
    (rows, 1) bias slab; per-layer row offsets are multiples of 16 (the bf16
    sublane tile) so in-kernel slices are tile-aligned."""

    def __init__(self, k_max):
        self.k_max = k_max
        self.items = []
        self.rows = 0

    def add(self, w2d, b):
        w2d = np.asarray(w2d, np.float32)
        b = np.asarray(b, np.float32).reshape(-1)
        cout, k = w2d.shape
        assert k <= self.k_max and cout == b.shape[0]
        off = self.rows
        self.items.append((off, w2d, b))
        self.rows += _round_up(cout, 16)
        return (off, int(cout), int(k))

    def finalize(self):
        ws = np.zeros((self.rows, self.k_max), np.float32)
        bs = np.zeros((self.rows, 1), np.float32)
        for off, w2d, b in self.items:
            cout, k = w2d.shape
            ws[off:off + cout, :k] = w2d
            bs[off:off + cout, 0] = b
        return jnp.asarray(ws, jnp.bfloat16), jnp.asarray(bs, jnp.float32)


def _w3x3(p):
    w = np.asarray(p["w"], np.float32)
    cout, cin = w.shape[:2]
    return w.transpose(0, 2, 3, 1).reshape(cout, 9 * cin), p["b"]


def _w1x1(p):
    return np.asarray(p["w"], np.float32)[:, :, 0, 0], p["b"]


def _wcenter(p):
    # 3x3 conv applied to a (zero-padded) 1x1 map -> only the centre tap acts.
    return np.asarray(p["w"], np.float32)[:, :, 1, 1], p["b"]


def _wfused_dr(p1x1, p3x3):
    # Fuse the 1x1 'distilled' conv with its sibling 3x3 conv (same input)
    # into one matrix; the 1x1 occupies the centre-tap column block.
    w1 = np.asarray(p1x1["w"], np.float32)[:, :, 0, 0]
    dcout, cin = w1.shape
    w1e = np.zeros((dcout, 9 * cin), np.float32)
    w1e[:, 4 * cin:5 * cin] = w1
    w3, b3 = _w3x3(p3x3)
    return (np.concatenate([w1e, w3], axis=0),
            np.concatenate([np.asarray(p1x1["b"], np.float32),
                            np.asarray(b3, np.float32)]))


def _probe_roll_direction():
    """pltpu.roll is expected to match jnp.roll (out[i] = x[(i - shift) % n]);
    probe it once so a convention change can never silently flip the conv
    taps (the tap shifts are chosen from the probe result)."""
    def k(x_ref, o_ref):
        o_ref[...] = pltpu.roll(x_ref[...], 1, axis=1)

    x = jnp.broadcast_to(lax.iota(jnp.float32, 128)[None, :], (8, 128))
    out = pl.pallas_call(
        k, out_shape=jax.ShapeDtypeStruct((8, 128), jnp.float32))(x)
    first = float(out[0, 0])
    if first == 127.0:
        return True
    if first == 1.0:
        return False
    raise RuntimeError("unexpected pltpu.roll semantics: out[0,0]=%r" % first)


def prepare_params(params):
    """Pack every conv weight/bias into two slabs (bf16 weights, f32 biases),
    once, host-side.  Returns (slabs, layout) where layout holds the static
    per-layer (row_offset, cout, k) slices and static channel counts."""
    nf, in_nc = params["fea_conv"]["w"].shape[:2]
    k_max = max(9 * nf, 9 * in_nc, 4 * nf)
    pk = _SlabPacker(k_max)

    layout = {"head": pk.add(*_w3x3(params["fea_conv"]))}
    for key in ("B1", "B2", "B3", "B4"):
        p = params[key]
        e = p["esa"]
        layout[key] = {
            "cr1": pk.add(*_wfused_dr(p["c1_d"], p["c1_r"])),
            "cr2": pk.add(*_wfused_dr(p["c2_d"], p["c2_r"])),
            "cr3": pk.add(*_wfused_dr(p["c3_d"], p["c3_r"])),
            "c4": pk.add(*_w3x3(p["c4"])),
            "c5": pk.add(*_w1x1(p["c5"])),
            "e1": pk.add(*_w1x1(e["conv1"])),
            "e2": pk.add(*_w3x3(e["conv2"])),
            "emax": pk.add(*_wcenter(e["conv_max"])),
            "e3": pk.add(*_wcenter(e["conv3"])),
            "e3b": pk.add(*_wcenter(e["conv3_"])),
            "ef": pk.add(*_w1x1(e["conv_f"])),
            "e4": pk.add(*_w1x1(e["conv4"])),
        }
    layout["c"] = pk.add(*_w1x1(params["c"]))
    layout["lr"] = pk.add(*_w3x3(params["LR_conv"]))
    layout["up"] = pk.add(*_w3x3(params["upsampler"]))

    layout["nf"] = int(nf)
    layout["in_nc"] = int(in_nc)
    layout["dc"] = int(params["B1"]["c4"]["w"].shape[0])
    layout["up_c"] = int(params["upsampler"]["w"].shape[0])
    layout["roll_like_jnp"] = _probe_roll_direction()

    w_slab, b_slab = pk.finalize()
    return {"w": w_slab, "b": b_slab}, layout


def _make_masks(H, W):
    """(10, H*W) bf16 constant: rows 0..8 are the boundary masks of the nine
    3x3-conv taps, row 9 is the ESA max-pool footprint (the conv2 stride-2
    output centres covered by the single 7x7/stride-3 pooling window)."""
    P = H * W
    pos = np.arange(P)
    hh, ww = pos // W, pos % W
    rows = []
    for di in (-1, 0, 1):
        for dj in (-1, 0, 1):
            ok = ((hh + di >= 0) & (hh + di < H)
                  & (ww + dj >= 0) & (ww + dj < W))
            rows.append(ok)
    pool = (hh % 2 == 1) & (hh <= 13) & (ww % 2 == 1) & (ww <= 13)
    rows.append(pool)
    return jnp.asarray(np.stack(rows).astype(np.float32), dtype=jnp.bfloat16)


# ----------------------------------------------------------------------------
# Forward pass (one pallas_call + plain-JAX pixel shuffle)
# ----------------------------------------------------------------------------
def fdcn_forward(slabs, x_nchw, *, layout, upscale):
    n, in_nc, H, W = x_nchw.shape
    assert in_nc == layout["in_nc"]
    s2h, s2w = (H - 3) // 2 + 1, (W - 3) // 2 + 1
    assert (min(s2h, s2w) >= 7 and (s2h - 7) // 3 == 0
            and (s2w - 7) // 3 == 0), (
        "fused ESA kernel assumes the pooled attention map is 1x1 "
        "(needs 7 <= (H-3)//2+1 <= 9); got H=%d W=%d" % (H, W))
    # TODO(synk): generalise the in-kernel ESA branch (strided conv / max-pool
    # / bilinear resize) to spatial sizes whose pooled attention map is > 1x1.

    p = H * W
    x = x_nchw.reshape(n, in_nc, p)              # NCHW -> lane-dense (N, C, HW)
    masks = _make_masks(H, W)                    # trace-time constant
    up_c = layout["up_c"]

    # TODO(synk): on single-TensorCore chips (v5e/v6e) fold the batch into the
    # lane axis ((C, N*H*W), grid=(1,)) to halve grid steps; grid=(N,) with
    # "parallel" keeps both v7x TensorCores busy and is near-neutral elsewhere.
    up = pl.pallas_call(
        functools.partial(_fdcn_kernel, H, W, layout),
        out_shape=jax.ShapeDtypeStruct((n, up_c, p), jnp.float32),
        grid=(n,),
        in_specs=[
            pl.BlockSpec((1, in_nc, p), lambda i: (i, 0, 0)),
            pl.BlockSpec(masks.shape, lambda i: (0, 0)),
            pl.BlockSpec(slabs["w"].shape, lambda i: (0, 0)),
            pl.BlockSpec(slabs["b"].shape, lambda i: (0, 0)),
        ],
        out_specs=pl.BlockSpec((1, up_c, p), lambda i: (i, 0, 0)),
        compiler_params=pltpu.CompilerParams(
            dimension_semantics=("parallel",)),
    )(x, masks, slabs["w"], slabs["b"])

    # pixel shuffle + NCHW output (plain-JAX boundary glue).
    out_nc = up_c // (upscale * upscale)
    u = up.reshape(n, out_nc, upscale, upscale, H, W)
    u = jnp.transpose(u, (0, 1, 4, 2, 5, 3))
    return u.reshape(n, out_nc, H * upscale, W * upscale)


# ----------------------------------------------------------------------------
# Pure-JAX f32 reference (mirrors the PyTorch module) for tolerance checking
# ----------------------------------------------------------------------------
def _conv_ref(x, p, stride=1, padding=0):
    y = lax.conv_general_dilated(
        x, p["w"], window_strides=(stride, stride),
        padding=[(padding, padding), (padding, padding)],
        dimension_numbers=("NCHW", "OIHW", "NCHW"))
    return y + p["b"].reshape(1, -1, 1, 1)


def _lrelu_ref(x):
    return jnp.where(x >= 0, x, NEG_SLOPE * x)


def _esa_ref(x, e):
    c1_ = _conv_ref(x, e["conv1"])
    c1 = _conv_ref(c1_, e["conv2"], stride=2, padding=0)
    v = lax.reduce_window(c1, -jnp.inf, lax.max,
                          (1, 1, 7, 7), (1, 1, 3, 3), "VALID")
    vr = jnp.maximum(_conv_ref(v, e["conv_max"], padding=1), 0.0)
    c3 = jnp.maximum(_conv_ref(vr, e["conv3"], padding=1), 0.0)
    c3 = _conv_ref(c3, e["conv3_"], padding=1)
    # Bilinear resize; for a 1x1 source (the case exercised here) this is a
    # constant broadcast, identical to torch align_corners=False behaviour.
    c3 = jax.image.resize(
        c3, (c3.shape[0], c3.shape[1], x.shape[2], x.shape[3]),
        method="bilinear")
    cf = _conv_ref(c1_, e["conv_f"])
    att = jax.nn.sigmoid(_conv_ref(c3 + cf, e["conv4"]))
    return x * att


def _fdcb_ref(x, p):
    d1 = _lrelu_ref(_conv_ref(x, p["c1_d"]))
    r1 = _lrelu_ref(_conv_ref(x, p["c1_r"], padding=1))
    d2 = _lrelu_ref(_conv_ref(r1, p["c2_d"]))
    r2 = _lrelu_ref(_conv_ref(r1, p["c2_r"], padding=1))
    d3 = _lrelu_ref(_conv_ref(r2, p["c3_d"]))
    r3 = _lrelu_ref(_conv_ref(r2, p["c3_r"], padding=1))
    r4 = _lrelu_ref(_conv_ref(r3, p["c4"], padding=1))
    feat = _conv_ref(jnp.concatenate([d1, d2, d3, r4], axis=1), p["c5"])
    return _esa_ref(feat, p["esa"])


def fdcn_reference(params, x, upscale):
    fea = _conv_ref(x, params["fea_conv"], padding=1)
    b1 = _fdcb_ref(fea, params["B1"])
    b2 = _fdcb_ref(b1, params["B2"])
    b3 = _fdcb_ref(b2, params["B3"])
    b4 = _fdcb_ref(b3, params["B4"])
    out_b = _lrelu_ref(_conv_ref(jnp.concatenate([b1, b2, b3, b4], 1),
                                 params["c"]))
    out_lr = _conv_ref(out_b, params["LR_conv"], padding=1) + fea
    up = _conv_ref(out_lr, params["upsampler"], padding=1)
    n, c, h, w = up.shape
    r = upscale
    oc = c // (r * r)
    u = up.reshape(n, oc, r, r, h, w).transpose(0, 1, 4, 2, 5, 3)
    return u.reshape(n, oc, h * r, w * r)


# ----------------------------------------------------------------------------
# Deterministic parameter init (PyTorch-Conv2d-style uniform fan-in bounds)
# ----------------------------------------------------------------------------
def init_fdcn_params(key, in_nc=3, nf=16, out_nc=3, upscale=4):
    keys = list(jax.random.split(key, 128))
    idx = [0]

    def conv(cin, cout, k):
        kw_, kb = jax.random.split(keys[idx[0]])
        idx[0] += 1
        bound = 1.0 / (cin * k * k) ** 0.5
        return {
            "w": jax.random.uniform(kw_, (cout, cin, k, k), jnp.float32,
                                    -bound, bound),
            "b": jax.random.uniform(kb, (cout,), jnp.float32, -bound, bound),
        }

    def fdcb():
        dc, f = nf // 2, nf // 4
        return {
            "c1_d": conv(nf, dc, 1), "c1_r": conv(nf, nf, 3),
            "c2_d": conv(nf, dc, 1), "c2_r": conv(nf, nf, 3),
            "c3_d": conv(nf, dc, 1), "c3_r": conv(nf, nf, 3),
            "c4": conv(nf, dc, 3), "c5": conv(4 * dc, nf, 1),
            "esa": {
                "conv1": conv(nf, f, 1), "conv_f": conv(f, f, 1),
                "conv_max": conv(f, f, 3), "conv2": conv(f, f, 3),
                "conv3": conv(f, f, 3), "conv3_": conv(f, f, 3),
                "conv4": conv(f, nf, 1),
            },
        }

    return {
        "fea_conv": conv(in_nc, nf, 3),
        "B1": fdcb(), "B2": fdcb(), "B3": fdcb(), "B4": fdcb(),
        "c": conv(nf * 4, nf, 1),
        "LR_conv": conv(nf, nf, 3),
        "upsampler": conv(nf, out_nc * upscale * upscale, 3),
    }


# ----------------------------------------------------------------------------
if __name__ == "__main__":
    IN_NC, NF, OUT_NC, UPSCALE = 3, 16, 3, 4
    N, H, W = 2, 16, 16

    key = jax.random.PRNGKey(0)
    pkey, xkey = jax.random.split(key)
    params = init_fdcn_params(pkey, in_nc=IN_NC, nf=NF,
                              out_nc=OUT_NC, upscale=UPSCALE)
    slabs, layout = prepare_params(params)       # host-side packing, once
    x = jax.random.normal(xkey, (N, IN_NC, H, W), jnp.float32)

    fwd = jax.jit(functools.partial(fdcn_forward, layout=layout,
                                    upscale=UPSCALE))
    out = fwd(slabs, x)
    jax.block_until_ready(out)

    assert out.shape == (N, OUT_NC, H * UPSCALE, W * UPSCALE), out.shape
    assert bool(jnp.all(jnp.isfinite(out)))

    # Explicit tolerance check vs a pure-JAX f32 reference (the kernel uses
    # bf16 weights/taps with f32 accumulation, so allow a small envelope).
    ref = fdcn_reference(params, x, UPSCALE)
    err = float(jnp.max(jnp.abs(out - ref)))
    scale = float(jnp.max(jnp.abs(ref)))
    assert err <= 0.05 * scale + 1e-4, ("kernel/reference mismatch", err, scale)

    print("KERNEL_OK")
</pallas_src>

<mosaic_0001>
module attributes {stable_mosaic.version = 11 : i64} {
  func.func @k(%arg0: memref<8x128xf32, #tpu.memory_space<vmem>>, %arg1: memref<8x128xf32, #tpu.memory_space<vmem>>) attributes {dimension_semantics = [], scalar_prefetch = 0 : i64, scratch_operands = 0 : i64, tpu.core_type = #tpu.core_type<tc>} {
    %c0 = arith.constant 0 : index
    %c0_0 = arith.constant 0 : index
    %0 = vector.load %arg0[%c0, %c0_0] : memref<8x128xf32, #tpu.memory_space<vmem>>, vector<8x128xf32>
    %c1_i32 = arith.constant 1 : i32
    %1 = tpu.dynamic_rotate %0 by %c1_i32 dim 1 : vector<8x128xf32>, i32 -> vector<8x128xf32>
    %c0_1 = arith.constant 0 : index
    %c0_2 = arith.constant 0 : index
    %2 = vector.load %arg1[%c0_1, %c0_2] : memref<8x128xf32, #tpu.memory_space<vmem>>, vector<8x128xf32>
    tpu.vector_store %arg1[%c0_1, %c0_2], %1 {strides = array<i32>} : memref<8x128xf32, #tpu.memory_space<vmem>>, vector<8x128xf32>,
    return
  }
}

</mosaic_0001>

<bundles_post_ra>
// kernel: tpu_custom_call.1
= control target key start
LH: loop header
LB: loop body
LE: loop exit
PB: predicated region body
PF: predicated region fallthrough
CT: control target
= control target key end

     0   :  { %6 = vsyncpa [#allocation3], 0  ;;  %s118_s0 = inlined_call_operand.hbm [shape: f32[8,128], index: 0, kind: input, shape index: {}]   ;;  %s119_s1 = inlined_call_operand.hbm [shape: f32[8,128], index: 1, kind: output, shape index: {}]  }
   0x1   :  { %7 = vsyncpa [#allocation4], 0  ;;  %s13_s8 = sshll.u32 %s118_s0, 4  ;;  %s99_s9 = smov [#allocation2]   ;;  %s14_s8 = int_to_ptr.hbm [resolvable:$true] %s13_s8 }
   0x2   :  { %s15_s10 = sshll.u32 %s99_s9, 4  ;;  %s16_s10 = int_to_ptr.vmem [resolvable:$true] %s15_s10 }
   0x3   :  { %18 = dma.hbm_to_vmem [thread:$0]  %s14_s8, 128, %s16_s10, [#allocation3]  }
   0x4   :  { %95 = dma.done.wait [#allocation3], 128  }
   0x5   :  { %96 = vsyncadd [#allocation3], 4294967168  ;;  %v23_v0 = vld [vmem:[#allocation2] sm:$0xff]  ;;  %s100_s11 = smov 1   ;;  %s101_s12 = smov [#allocation5]  }
   0x6   :  { %24 = vrot.lane.b32.xlu0 %v23_v0, %s100_s11  ;;  %s32_s13 = sshll.u32 %s101_s12, 4  ;;  %s34_s16 = sshll.u32 %s119_s1, 4  ;;  %s33_s13 = int_to_ptr.vmem [resolvable:$true] %s32_s13  ;;  %s35_s16 = int_to_ptr.hbm [resolvable:$true] %s34_s16 }
  0x78   :  { %v25_v1 = vpop.permute.xlu0 %24 }
  0x79   :  { %26 = vst [vmem:[#allocation5] sm:$0xff] %v25_v1 }
  0x7a   :  { %37 = dma.vmem_to_hbm [thread:$0]  %s33_s13, 128, %s35_s16, [#allocation4]  }
  0x7b   :  { %97 = dma.done.wait [#allocation4], 128  }
  0x7c   :  { %98 = vsyncadd [#allocation4], 4294967168 }
  0x7d   :  { %42 = vsyncpa [#allocation3], 1 }
  0x7e   :  { %43 = vsyncpa [#allocation4], 1 }

</bundles_post_ra>
